<compile_context>
chip_gen: v6e
topology: v6e:2x2x1
jax: 0.10.0
libtpu: 0.0.40
codegen_flags: <defaults>
</compile_context>

<pallas_src>
import jax
import jax.numpy as jnp
from jax.experimental import pallas as pl
from jax.experimental.pallas import tpu as pltpu


def _round_up(n, m):
    return ((n + m - 1) // m) * m


def _critic_kernel(xu_ref, w1_ref, b1_ref, w2_ref, b2_ref,
                   w3_ref, b3_ref, w4t_ref, b4_ref, out_ref):
    bf16 = jnp.bfloat16
    # Layer 1: Linear(state+action -> 128) + ReLU.  xu is already bf16 and
    # already cat([x,u],1) (fused in the wrapper) -> a single K=16 MXU pass.
    h = jnp.dot(xu_ref[...], w1_ref[...], preferred_element_type=jnp.float32)
    h = jnp.maximum(h + b1_ref[...], 0.0).astype(bf16)   # bf16 inter-layer tile
    # Layer 2: Linear(128 -> 64) + ReLU
    h = jnp.dot(h, w2_ref[...], preferred_element_type=jnp.float32)
    h = jnp.maximum(h + b2_ref[...], 0.0).astype(bf16)
    # Layer 3: Linear(64 -> 32) + ReLU
    h = jnp.dot(h, w3_ref[...], preferred_element_type=jnp.float32)
    h = jnp.maximum(h + b3_ref[...], 0.0)                 # small (TB,32) f32
    # Layer 4: Linear(32 -> 1) on the VPU/XLU (broadcast-mul + lane reduce);
    # an N=1 matmul would waste the MXU and add a FIFO round-trip.
    o = jnp.sum(h * w4t_ref[...], axis=-1, keepdims=True) + b4_ref[...]
    out_ref[...] = o.astype(out_ref.dtype)


def critic_forward(x, u, params, *, tb=2048):
    """x: (B, state_dim) f32, u: (B, action_dim) f32 -> (B, 1) f32."""
    B, state_dim = x.shape
    action_dim = u.shape[1]
    K = state_dim + action_dim

    # Fuse the torch.cat([x, u], 1) with the bf16 cast into one wrapper op
    # (~32 B/row); the kernel then sees a single lane-contiguous input stream
    # and layer 1 becomes one K=16 matmul.
    xu = jnp.concatenate([x, u], axis=1).astype(jnp.bfloat16)

    # Batch tile: multiple of 8 sublanes, cap `tb`; force >=2 grid steps when
    # B allows so the "parallel" axis shards across both v7x TensorCores
    # (harmless on single-TC v5e/v6e).
    TB = max(8, min(tb, _round_up(pl.cdiv(B, 2), 8)))
    grid = (pl.cdiv(B, TB),)   # partial last block handled by Pallas masking

    def resident_spec(arr):
        # Full-array block, constant index_map -> stays in VMEM across steps.
        return pl.BlockSpec(arr.shape, lambda i: (0, 0))

    operands = (
        xu,
        params["w1"], params["b1"],
        params["w2"], params["b2"],
        params["w3"], params["b3"],
        params["w4t"], params["b4"],
    )
    in_specs = [pl.BlockSpec((TB, K), lambda i: (i, 0))]
    in_specs += [resident_spec(a) for a in operands[1:]]

    flops = 2 * B * (K * 128 + 128 * 64 + 64 * 32 + 32)
    w_bytes = 2 * (K * 128 + 128 * 64 + 64 * 32)          # bf16 matmul weights
    w_bytes += 4 * (128 + 64 + 32 + 32 + 1)               # f32 biases + w4t
    io_bytes = 2 * B * K + 4 * B                          # bf16 in, f32 out
    cost = pl.CostEstimate(flops=flops, transcendentals=0,
                           bytes_accessed=w_bytes + io_bytes)

    return pl.pallas_call(
        _critic_kernel,
        out_shape=jax.ShapeDtypeStruct((B, 1), jnp.float32),
        grid=grid,
        in_specs=in_specs,
        out_specs=pl.BlockSpec((TB, 1), lambda i: (i, 0)),
        compiler_params=pltpu.CompilerParams(
            dimension_semantics=("parallel",)),
        cost_estimate=cost,
    )(*operands)


def init_params(state_dim, action_dim, key):
    """Deterministic synthetic init (uniform, PyTorch-Linear-like fan-in scaling).

    Matmul weights stored in bf16 (native MXU path, half the weight DMA);
    biases and the tiny VPU-side w4 stay f32.
    """
    dims = [(state_dim + action_dim, 128), (128, 64), (64, 32), (32, 1)]
    raw = {}
    for i, (fan_in, fan_out) in enumerate(dims, start=1):
        key, kw, kb = jax.random.split(key, 3)
        bound = 1.0 / jnp.sqrt(jnp.float32(fan_in))
        raw[f"w{i}"] = jax.random.uniform(
            kw, (fan_in, fan_out), jnp.float32, -bound, bound)
        raw[f"b{i}"] = jax.random.uniform(
            kb, (1, fan_out), jnp.float32, -bound, bound)

    bf16 = jnp.bfloat16
    return {
        "w1": raw["w1"].astype(bf16),        # (S+A, 128) — single layer-1 weight
        "b1": raw["b1"],
        "w2": raw["w2"].astype(bf16),
        "b2": raw["b2"],
        "w3": raw["w3"].astype(bf16),
        "b3": raw["b3"],
        "w4t": raw["w4"].T,                  # (1, 32) f32, VPU reduce
        "b4": raw["b4"],
    }


def _reference_forward(x, u, params):
    """Pure-JAX reference using the same mixed-precision recipe."""
    bf16 = jnp.bfloat16
    xu = jnp.concatenate([x, u], axis=1).astype(bf16)
    h = jnp.dot(xu, params["w1"], preferred_element_type=jnp.float32)
    h = jnp.maximum(h + params["b1"], 0.0).astype(bf16)
    h = jnp.dot(h, params["w2"], preferred_element_type=jnp.float32)
    h = jnp.maximum(h + params["b2"], 0.0).astype(bf16)
    h = jnp.dot(h, params["w3"], preferred_element_type=jnp.float32)
    h = jnp.maximum(h + params["b3"], 0.0)
    return jnp.sum(h * params["w4t"], axis=-1, keepdims=True) + params["b4"]


if __name__ == "__main__":
    state_dim, action_dim, batch = 12, 4, 8

    key = jax.random.PRNGKey(0)
    key, kx, ku = jax.random.split(key, 3)
    x = jax.random.normal(kx, (batch, state_dim), jnp.float32)
    u = jax.random.normal(ku, (batch, action_dim), jnp.float32)

    params = init_params(state_dim, action_dim, key)

    out = critic_forward(x, u, params)
    jax.block_until_ready(out)

    ref = _reference_forward(x, u, params)
    assert out.shape == (batch, 1)
    assert jnp.allclose(out, ref, atol=1e-3, rtol=1e-3), (out, ref)

    # Non-tile-aligned, larger batch: exercises the multi-step grid (>=2 steps
    # for v7x megacore) and the masked partial last block (no pad / no slice).
    kx2, ku2 = jax.random.split(jax.random.PRNGKey(1))
    x2 = jax.random.normal(kx2, (1000, state_dim), jnp.float32)
    u2 = jax.random.normal(ku2, (1000, action_dim), jnp.float32)
    out2 = critic_forward(x2, u2, params)
    jax.block_until_ready(out2)
    ref2 = _reference_forward(x2, u2, params)
    assert out2.shape == (1000, 1)
    assert jnp.allclose(out2, ref2, atol=1e-3, rtol=1e-3)

    print("KERNEL_OK")
</pallas_src>

<mosaic_0001>
module attributes {stable_mosaic.version = 11 : i64} {
  func.func @_critic_kernel(%arg0: i32, %arg1: memref<8x16xbf16, #tpu.memory_space<vmem>>, %arg2: memref<16x128xbf16, #tpu.memory_space<vmem>>, %arg3: memref<1x128xf32, #tpu.memory_space<vmem>>, %arg4: memref<128x64xbf16, #tpu.memory_space<vmem>>, %arg5: memref<1x64xf32, #tpu.memory_space<vmem>>, %arg6: memref<64x32xbf16, #tpu.memory_space<vmem>>, %arg7: memref<1x32xf32, #tpu.memory_space<vmem>>, %arg8: memref<1x32xf32, #tpu.memory_space<vmem>>, %arg9: memref<1x1xf32, #tpu.memory_space<vmem>>, %arg10: memref<8x1xf32, #tpu.memory_space<vmem>>) attributes {dimension_semantics = [#tpu.dimension_semantics<parallel>], iteration_bounds = array<i64: 1>, scalar_prefetch = 0 : i64, scratch_operands = 0 : i64, tpu.core_type = #tpu.core_type<tc>, window_params = [{transform_indices = @transform_0, window_bounds = array<i64: 8, 16>}, {pipeline_mode = #tpu.pipeline_mode<synchronous>, transform_indices = @transform_1, window_bounds = array<i64: 16, 128>}, {pipeline_mode = #tpu.pipeline_mode<synchronous>, transform_indices = @transform_2, window_bounds = array<i64: 1, 128>}, {pipeline_mode = #tpu.pipeline_mode<synchronous>, transform_indices = @transform_3, window_bounds = array<i64: 128, 64>}, {pipeline_mode = #tpu.pipeline_mode<synchronous>, transform_indices = @transform_4, window_bounds = array<i64: 1, 64>}, {pipeline_mode = #tpu.pipeline_mode<synchronous>, transform_indices = @transform_5, window_bounds = array<i64: 64, 32>}, {pipeline_mode = #tpu.pipeline_mode<synchronous>, transform_indices = @transform_6, window_bounds = array<i64: 1, 32>}, {pipeline_mode = #tpu.pipeline_mode<synchronous>, transform_indices = @transform_7, window_bounds = array<i64: 1, 32>}, {pipeline_mode = #tpu.pipeline_mode<synchronous>, transform_indices = @transform_8, window_bounds = array<i64: 1, 1>}, {transform_indices = @transform_9, window_bounds = array<i64: 8, 1>}]} {
    %c0 = arith.constant 0 : index
    %c0_0 = arith.constant 0 : index
    %0 = vector.load %arg1[%c0, %c0_0] : memref<8x16xbf16, #tpu.memory_space<vmem>>, vector<8x16xbf16>
    %c0_1 = arith.constant 0 : index
    %c0_2 = arith.constant 0 : index
    %1 = vector.load %arg2[%c0_1, %c0_2] : memref<16x128xbf16, #tpu.memory_space<vmem>>, vector<16x128xbf16>
    %cst = arith.constant dense<0.000000e+00> : vector<8x128xf32>
    %2 = tpu.matmul %0, %1, %cst {dimension_numbers = #tpu.dot_dimension_numbers<[1], [0], [0], [1], [0, 0, 1, 1], [], []>} : vector<8x16xbf16>, vector<16x128xbf16>, vector<8x128xf32> -> vector<8x128xf32>
    %c0_3 = arith.constant 0 : index
    %c0_4 = arith.constant 0 : index
    %3 = vector.load %arg3[%c0_3, %c0_4] : memref<1x128xf32, #tpu.memory_space<vmem>>, vector<1x128xf32>
    %4 = vector.broadcast %3 : vector<1x128xf32> to vector<8x128xf32>
    %5 = arith.addf %2, %4 : vector<8x128xf32>
    %cst_5 = arith.constant 0.000000e+00 : f32
    %6 = vector.broadcast %cst_5 : f32 to vector<8x128xf32>
    %7 = arith.maximumf %5, %6 : vector<8x128xf32>
    %8 = arith.truncf %7 : vector<8x128xf32> to vector<8x128xbf16>
    %c0_6 = arith.constant 0 : index
    %c0_7 = arith.constant 0 : index
    %9 = vector.load %arg4[%c0_6, %c0_7] : memref<128x64xbf16, #tpu.memory_space<vmem>>, vector<128x64xbf16>
    %cst_8 = arith.constant dense<0.000000e+00> : vector<8x64xf32>
    %10 = tpu.matmul %8, %9, %cst_8 {dimension_numbers = #tpu.dot_dimension_numbers<[1], [0], [0], [1], [0, 0, 1, 1], [], []>} : vector<8x128xbf16>, vector<128x64xbf16>, vector<8x64xf32> -> vector<8x64xf32>
    %c0_9 = arith.constant 0 : index
    %c0_10 = arith.constant 0 : index
    %11 = vector.load %arg5[%c0_9, %c0_10] : memref<1x64xf32, #tpu.memory_space<vmem>>, vector<1x64xf32>
    %12 = vector.broadcast %11 : vector<1x64xf32> to vector<8x64xf32>
    %13 = arith.addf %10, %12 : vector<8x64xf32>
    %cst_11 = arith.constant 0.000000e+00 : f32
    %14 = vector.broadcast %cst_11 : f32 to vector<8x64xf32>
    %15 = arith.maximumf %13, %14 : vector<8x64xf32>
    %16 = arith.truncf %15 : vector<8x64xf32> to vector<8x64xbf16>
    %c0_12 = arith.constant 0 : index
    %c0_13 = arith.constant 0 : index
    %17 = vector.load %arg6[%c0_12, %c0_13] : memref<64x32xbf16, #tpu.memory_space<vmem>>, vector<64x32xbf16>
    %cst_14 = arith.constant dense<0.000000e+00> : vector<8x32xf32>
    %18 = tpu.matmul %16, %17, %cst_14 {dimension_numbers = #tpu.dot_dimension_numbers<[1], [0], [0], [1], [0, 0, 1, 1], [], []>} : vector<8x64xbf16>, vector<64x32xbf16>, vector<8x32xf32> -> vector<8x32xf32>
    %c0_15 = arith.constant 0 : index
    %c0_16 = arith.constant 0 : index
    %19 = vector.load %arg7[%c0_15, %c0_16] : memref<1x32xf32, #tpu.memory_space<vmem>>, vector<1x32xf32>
    %20 = vector.broadcast %19 : vector<1x32xf32> to vector<8x32xf32>
    %21 = arith.addf %18, %20 : vector<8x32xf32>
    %cst_17 = arith.constant 0.000000e+00 : f32
    %22 = vector.broadcast %cst_17 : f32 to vector<8x32xf32>
    %23 = arith.maximumf %21, %22 : vector<8x32xf32>
    %c0_18 = arith.constant 0 : index
    %c0_19 = arith.constant 0 : index
    %24 = vector.load %arg8[%c0_18, %c0_19] : memref<1x32xf32, #tpu.memory_space<vmem>>, vector<1x32xf32>
    %25 = vector.broadcast %24 : vector<1x32xf32> to vector<8x32xf32>
    %26 = arith.mulf %23, %25 : vector<8x32xf32>
    %cst_20 = arith.constant dense<0.000000e+00> : vector<8xf32>
    %27 = vector.multi_reduction <add>, %26, %cst_20 [1] : vector<8x32xf32> to vector<8xf32>
    %28 = vector.shape_cast %27 : vector<8xf32> to vector<8x1xf32>
    %c0_21 = arith.constant 0 : index
    %c0_22 = arith.constant 0 : index
    %29 = vector.load %arg9[%c0_21, %c0_22] : memref<1x1xf32, #tpu.memory_space<vmem>>, vector<1x1xf32>
    %30 = vector.broadcast %29 : vector<1x1xf32> to vector<8x1xf32>
    %31 = arith.addf %28, %30 : vector<8x1xf32>
    %c0_23 = arith.constant 0 : index
    %c0_24 = arith.constant 0 : index
    %32 = vector.load %arg10[%c0_23, %c0_24] : memref<8x1xf32, #tpu.memory_space<vmem>>, vector<8x1xf32>
    tpu.vector_store %arg10[%c0_23, %c0_24], %31 {strides = array<i32>} : memref<8x1xf32, #tpu.memory_space<vmem>>, vector<8x1xf32>,
    return
  }
  func.func @transform_0(%arg0: i32) -> (i32, i32) {
    %c0_i32 = arith.constant 0 : i32
    %c0_i32_0 = arith.constant 0 : i32
    return %arg0, %c0_i32 : i32, i32
  }
  func.func @transform_1(%arg0: i32) -> (i32, i32) {
    %c0_i32 = arith.constant 0 : i32
    %c0_i32_0 = arith.constant 0 : i32
    %c0_i32_1 = arith.constant 0 : i32
    return %c0_i32, %c0_i32_0 : i32, i32
  }
  func.func @transform_2(%arg0: i32) -> (i32, i32) {
    %c0_i32 = arith.constant 0 : i32
    %c0_i32_0 = arith.constant 0 : i32
    %c0_i32_1 = arith.constant 0 : i32
    return %c0_i32, %c0_i32_0 : i32, i32
  }
  func.func @transform_3(%arg0: i32) -> (i32, i32) {
    %c0_i32 = arith.constant 0 : i32
    %c0_i32_0 = arith.constant 0 : i32
    %c0_i32_1 = arith.constant 0 : i32
    return %c0_i32, %c0_i32_0 : i32, i32
  }
  func.func @transform_4(%arg0: i32) -> (i32, i32) {
    %c0_i32 = arith.constant 0 : i32
    %c0_i32_0 = arith.constant 0 : i32
    %c0_i32_1 = arith.constant 0 : i32
    return %c0_i32, %c0_i32_0 : i32, i32
  }
  func.func @transform_5(%arg0: i32) -> (i32, i32) {
    %c0_i32 = arith.constant 0 : i32
    %c0_i32_0 = arith.constant 0 : i32
    %c0_i32_1 = arith.constant 0 : i32
    return %c0_i32, %c0_i32_0 : i32, i32
  }
  func.func @transform_6(%arg0: i32) -> (i32, i32) {
    %c0_i32 = arith.constant 0 : i32
    %c0_i32_0 = arith.constant 0 : i32
    %c0_i32_1 = arith.constant 0 : i32
    return %c0_i32, %c0_i32_0 : i32, i32
  }
  func.func @transform_7(%arg0: i32) -> (i32, i32) {
    %c0_i32 = arith.constant 0 : i32
    %c0_i32_0 = arith.constant 0 : i32
    %c0_i32_1 = arith.constant 0 : i32
    return %c0_i32, %c0_i32_0 : i32, i32
  }
  func.func @transform_8(%arg0: i32) -> (i32, i32) {
    %c0_i32 = arith.constant 0 : i32
    %c0_i32_0 = arith.constant 0 : i32
    %c0_i32_1 = arith.constant 0 : i32
    return %c0_i32, %c0_i32_0 : i32, i32
  }
  func.func @transform_9(%arg0: i32) -> (i32, i32) {
    %c0_i32 = arith.constant 0 : i32
    %c0_i32_0 = arith.constant 0 : i32
    return %arg0, %c0_i32 : i32, i32
  }
}

</mosaic_0001>

<bundles_post_ra>
// kernel: tpu_custom_call.1
= control target key start
LH: loop header
LB: loop body
LE: loop exit
PB: predicated region body
PF: predicated region fallthrough
CT: control target
= control target key end

     0   :  { %v409_v0 = vmov 0.0   ;;  %vm410_vm0 = vmmov 0   ;;  %vm51_vm1 = vcmask 130048   ;;  %vm249_vm2 = vcmask 523264   ;;  %s521_s1 = inlined_call_operand.vmem [shape: bf16[16,128], index: 1, kind: input, shape index: {}]   ;;  %s522_s0 = inlined_call_operand.vmem [shape: bf16[8,16], index: 0, kind: input, shape index: {}]   ;;  %s523_s3 = inlined_call_operand.vmem [shape: bf16[128,64], index: 3, kind: input, shape index: {}]   ;;  %s524_s5 = inlined_call_operand.vmem [shape: bf16[64,32], index: 5, kind: input, shape index: {}]   ;;  %s525_s2 = inlined_call_operand.vmem [shape: f32[1,128], index: 2, kind: input, shape index: {}]   ;;  %s526_s4 = inlined_call_operand.vmem [shape: f32[1,64], index: 4, kind: input, shape index: {}]   ;;  %s527_s8 = inlined_call_operand.<no memory space> [shape: f32[1,1], index: 8, kind: input, shape index: {}]   ;;  %s528_s6 = inlined_call_operand.vmem [shape: f32[1,32], index: 6, kind: input, shape index: {}]   ;;  %s529_s7 = inlined_call_operand.vmem [shape: f32[1,32], index: 7, kind: input, shape index: {}]   ;;  %s530_s9 = inlined_call_operand.vmem [shape: f32[8,1], index: 9, kind: output, shape index: {}]  }
   0x1   :  { %356 = vmatprep.subr.bf16.mxu0 %v409_v0  ;;  %v396_v1 = vld [vmem:[%s521_s1] sm:$0xff]   ;;  %358 = vmatprep.mubr.msk.bf16.mxu0 %vm410_vm0, %v409_v0  ;;  %v397_v3 = vld [vmem:[%s523_s3 + $0x38] sm:$0xff]   ;;  %v398_v4 = vld [vmem:[%s523_s3 + $0x30] sm:$0xff]   ;;  %v14_v31 = vstv %s527_s8  ;;  %vm302_vm3 = vcmask 261120   ;;  %vm314_vm4 = vcmask 7168  }
   0x2   :  { %v35_v2 = vld [vmem:[%s522_s0] sm:$0xf]  ;;  %362 = vmatprep.subr.bf16.mxu1 %v409_v0  ;;  %378 = vmatprep.mubr.msk.bf16.mxu1 %vm410_vm0, %v409_v0  ;;  %v399_v5 = vld [vmem:[%s523_s3 + $0x28] sm:$0xff]   ;;  %v401_v7 = vld [vmem:[%s523_s3 + $0x18] sm:$0xff]   ;;  %15 = vst [vmem:[#allocation2] sm:$0x1] %v14_v31 }
   0x3   :  { %357 = vmatpush3.bf16.msra.mxu0 %v396_v1  ;;  %363 = vmatpush3.bf16.msra.mxu1 %v397_v3  ;;  %v400_v6 = vld [vmem:[%s523_s3 + $0x20] sm:$0xff]   ;;  %v402_v8 = vld [vmem:[%s523_s3 + $0x10] sm:$0xff]   ;;  %v403_v9 = vld [vmem:[%s523_s3 + $0x8] sm:$0xff]  }
   0x4   :  { %382 = vmatprep.subr.bf16.mxu0 %v409_v0  ;;  %364 = vmatprep.subr.bf16.mxu1 %v409_v0  ;;  %v404_v10 = vld [vmem:[%s523_s3] sm:$0xff]   ;;  %v405_v11 = vld [vmem:[%s524_s5 + $0x18] sm:$0xff]   ;;  %v406_v12 = vld [vmem:[%s524_s5 + $0x10] sm:$0xff]  }
   0x5   :  { %v320_v13 = vld [vmem:[%s525_s2] ss:$0 sm:$0xff]  ;;  %v407_v21 = vld [vmem:[%s524_s5 + $0x8] sm:$0xff]  }
   0x6   :  { %359 = vmatmul.mubr.msk.bf16.vlgmr.msra.gmra.mxu0 %vm51_vm1, %v35_v2  ;;  %v408_v22 = vld [vmem:[%s524_s5] sm:$0xff]  }
   0x7   :  { %390 = vmatprep.mubr.msk.bf16.mxu0 %vm410_vm0, %v409_v0  ;;  %365 = vmatpush3.bf16.msra.mxu1 %v398_v4  ;;  %v323_v23 = vld [vmem:[%s526_s4] ss:$0 sm:$0xff] }
   0x8   :  { %366 = vmatprep.subr.bf16.mxu1 %v409_v0  ;;  %383 = vmatpush3.bf16.msra.mxu0 %v405_v11  ;;  %v332_v32 = vld [vmem:[%s528_s6] ss:$0 sm:$0xff] }
   0x9   :  { %384 = vmatprep.subr.bf16.mxu0 %v409_v0  ;;  %v338_v36 = vld [vmem:[%s529_s7] ss:$0 sm:$0xff] }
   0xa   :  { %v339_v42 = vld [vmem:[#allocation2] ss:$0 sm:$0xff] }
   0xb   :  { %367 = vmatpush3.bf16.msra.mxu1 %v399_v5 }
   0xc   :  { %368 = vmatprep.subr.bf16.mxu1 %v409_v0  ;;  %385 = vmatpush3.bf16.msra.mxu0 %v406_v12 }
   0xd   :  { %386 = vmatprep.subr.bf16.mxu0 %v409_v0 }
   0xf   :  { %369 = vmatpush3.bf16.msra.mxu1 %v400_v6 }
  0x10   :  { %370 = vmatprep.subr.bf16.mxu1 %v409_v0  ;;  %387 = vmatpush3.bf16.msra.mxu0 %v407_v21 }
  0x11   :  { %388 = vmatprep.subr.bf16.mxu0 %v409_v0 }
  0x13   :  { %371 = vmatpush3.bf16.msra.mxu1 %v401_v7 }
  0x14   :  { %372 = vmatprep.subr.bf16.mxu1 %v409_v0  ;;  %389 = vmatpush3.bf16.msra.mxu0 %v408_v22 }
  0x17   :  { %373 = vmatpush3.bf16.msra.mxu1 %v402_v8 }
  0x18   :  { %374 = vmatprep.subr.bf16.mxu1 %v409_v0 }
  0x1b   :  { %375 = vmatpush3.bf16.msra.mxu1 %v403_v9 }
  0x1c   :  { %376 = vmatprep.subr.bf16.mxu1 %v409_v0 }
  0x1f   :  { %377 = vmatpush3.bf16.msra.mxu1 %v404_v10 }
  0xc6   :  { %v89_v14 = vpop.f32.mrf.mxu0 }
  0xc7   :  { %v90_v15 = vadd.f32 %v320_v13, %v89_v14 }
  0xc8   :  { %v360_v16 = vpop.f32.mrf.mxu0 }
  0xc9   :  { %v95_v17 = vmax.f32 %v90_v15, 0.0 }
  0xca   :  { %v92_v18 = vpop.f32.mrf.mxu0 }
  0xcb   :  { %v96_v19 = vpack.c.bf16 %v95_v17, %v95_v17 }
  0xcc   :  { %v361_v20 = vpop.f32.mrf.mxu0 }
  0xcd   :  { %379 = vmatmul.mubr.bf16.vlgmr.msra.gmra.mxu1 %v96_v19 }
 0x18d   :  { %v202_v24 = vpop.f32.mrf.mxu1 }
 0x18e   :  { %v203_v25 = vadd.f32 %v323_v23, %v202_v24 }
 0x18f   :  { %v380_v26 = vpop.f32.mrf.mxu1 }
 0x190   :  { %v208_v27 = vmax.f32 %v203_v25, 0.0 }
 0x191   :  { %v205_v28 = vpop.f32.mrf.mxu1 }
 0x192   :  { %v209_v29 = vpack.c.bf16 %v208_v27, %v208_v27 }
 0x193   :  { %v381_v30 = vpop.f32.mrf.mxu1 }
 0x194   :  { %391 = vmatmul.mubr.msk.bf16.vlgmr.msra.gmra.mxu0 %vm249_vm2, %v209_v29 }
 0x254   :  { %v287_v33 = vpop.f32.mrf.mxu0 }
 0x255   :  { %v288_v34 = vadd.f32 %v332_v32, %v287_v33 }
 0x256   :  { %v392_v35 = vpop.f32.mrf.mxu0 }
 0x257   :  { %v293_v37 = vmax.f32 %v288_v34, 0.0 }
 0x258   :  { %v290_v38 = vpop.f32.mrf.mxu0 }
 0x259   :  { %v301_v39 = vmul.f32 %v338_v36, %v293_v37 }
 0x25a   :  { %v393_v40 = vpop.f32.mrf.mxu0 }
 0x25b   :  { %v303_v41 = vsel %vm302_vm3, %v301_v39, 0.0 }
 0x25c   :  { %304 = vadd.xlane.f32.xlu0 %v303_v41 }
 0x2e5   :  { %v305_v43 = vpop.xlane.xlu0 %304 }
 0x2e6   :  { %v313_v44 = vadd.f32 %v339_v42, %v305_v43 }
 0x2e8   :  { %315 = vst.msk [vmem:[%s530_s9] sm:$0xff] %vm314_vm4, %v313_v44 }

</bundles_post_ra>
